<compile_context>
chip_gen: v6e
topology: v6e:2x2x1
jax: 0.10.0
libtpu: 0.0.40
codegen_flags: <defaults>
</compile_context>

<pallas_src>
import math

import jax
import jax.numpy as jnp
from jax.experimental import pallas as pl
from jax.experimental.pallas import tpu as pltpu

# ----------------------------- config ---------------------------------------
B = 2            # batch
C = 4            # backbone.num_channels
H = W = 16       # feature map spatial size
D = 32           # transformer.d_model (hidden_dim)
Q = 8            # num_queries
NUM_CLASSES = 4  # -> class head outputs NUM_CLASSES + 1 logits
S = H * W        # flattened spatial length


# --------------------------- fused Pallas kernel -----------------------------
def _detr_fused_kernel(src_ref, pos_ref, bias_ref, qe_ref,
                       pw_ref, pb_ref, cw_ref, cb_ref,
                       w1_ref, b1_ref, w2_ref, b2_ref, w3_ref, b3_ref,
                       logits_ref, boxes_ref):
    # ---- input_proj (1x1 conv == per-pixel linear), lane-dense (D, S) -------
    x = src_ref[0]                                              # (C, S)
    mem_t = (jnp.dot(pw_ref[...], x, preferred_element_type=jnp.float32)
             + pb_ref[...])                                     # (D, S)
    keys_t = mem_t + pos_ref[0]                                 # (D, S)

    # ---- single-head cross-attention of the queries over the memory --------
    q = qe_ref[...]                                             # (Q, D)
    scale = 1.0 / math.sqrt(q.shape[-1])
    s = jnp.dot(q, keys_t, preferred_element_type=jnp.float32) * scale  # (Q, S)
    s = s + bias_ref[0]                                         # (1, S) bcast
    s = s - jnp.max(s, axis=-1, keepdims=True)
    p = jnp.exp(s)
    p = p * pl.reciprocal(jnp.sum(p, axis=-1, keepdims=True), approx=True)
    # (Q, D) = P(Q,S) . memory^T(D,S), contracting S — no explicit transpose.
    hs = jax.lax.dot_general(p, mem_t, (((1,), (1,)), ((), ())),
                             preferred_element_type=jnp.float32)

    # ---- class head: Linear(D, num_classes + 1) -----------------------------
    logits = (jnp.dot(hs, cw_ref[...], preferred_element_type=jnp.float32)
              + cb_ref[...])
    logits_ref[0] = logits.astype(logits_ref.dtype)

    # ---- bbox head: the PyTorch `MLP` (3 layers, ReLU between) + sigmoid ----
    h = jnp.maximum(
        jnp.dot(hs, w1_ref[...], preferred_element_type=jnp.float32)
        + b1_ref[...], 0.0)
    h = jnp.maximum(
        jnp.dot(h, w2_ref[...], preferred_element_type=jnp.float32)
        + b2_ref[...], 0.0)
    box = (jnp.dot(h, w3_ref[...], preferred_element_type=jnp.float32)
           + b3_ref[...])
    boxes_ref[0] = (1.0 / (1.0 + jnp.exp(-box))).astype(boxes_ref.dtype)


def _full_spec(a):
    nd = a.ndim
    return pl.BlockSpec(a.shape, lambda i: (0,) * nd)


def detr_fused_pallas(src_cs, pos_cs, mask_bias, p):
    b, c, s = src_cs.shape
    d = p["proj_wT"].shape[0]
    q = p["query_embed"].shape[0]
    ncls = p["class_w"].shape[1]

    weights = (p["query_embed"], p["proj_wT"], p["proj_b"],
               p["class_w"], p["class_b"],
               p["mlp_w1"], p["mlp_b1"], p["mlp_w2"], p["mlp_b2"],
               p["mlp_w3"], p["mlp_b3"])

    in_specs = [
        pl.BlockSpec((1, c, s), lambda i: (i, 0, 0)),      # src   (B, C, S)
        pl.BlockSpec((1, d, s), lambda i: (i, 0, 0)),      # pos   (B, D, S)
        pl.BlockSpec((1, 1, s), lambda i: (i, 0, 0)),      # bias  (B, 1, S)
    ] + [_full_spec(a) for a in weights]

    return pl.pallas_call(
        _detr_fused_kernel,
        out_shape=(
            jax.ShapeDtypeStruct((b, q, ncls), src_cs.dtype),
            jax.ShapeDtypeStruct((b, q, 4), src_cs.dtype),
        ),
        grid=(b,),
        in_specs=in_specs,
        out_specs=(
            pl.BlockSpec((1, q, ncls), lambda i: (i, 0, 0)),
            pl.BlockSpec((1, q, 4), lambda i: (i, 0, 0)),
        ),
        compiler_params=pltpu.CompilerParams(
            dimension_semantics=("parallel",)),
    )(src_cs, pos_cs, mask_bias, *weights)


# --------------------------- glue (plain JAX) --------------------------------
def position_embedding_sine(mask, num_pos_feats):
    # DETR's PositionEmbeddingSine; mask: (B, H, W) bool, True = padding.
    not_mask = jnp.logical_not(mask)
    y_embed = jnp.cumsum(not_mask, axis=1).astype(jnp.float32)
    x_embed = jnp.cumsum(not_mask, axis=2).astype(jnp.float32)
    half = num_pos_feats // 2
    temperature = 10000.0
    dim_t = jnp.arange(half, dtype=jnp.float32)
    dim_t = temperature ** (2.0 * jnp.floor(dim_t / 2.0) / half)
    pos_x = x_embed[..., None] / dim_t
    pos_y = y_embed[..., None] / dim_t

    def interleave(p):
        return jnp.stack([jnp.sin(p[..., 0::2]), jnp.cos(p[..., 1::2])],
                         axis=4).reshape(p.shape[0], p.shape[1], p.shape[2], -1)

    pos = jnp.concatenate([interleave(pos_y), interleave(pos_x)], axis=3)
    return pos.transpose(0, 3, 1, 2)  # (B, D, H, W)


def init_params(key):
    ks = jax.random.split(key, 8)
    std = 0.02
    return {
        # input_proj: Conv2d(C, D, kernel_size=1) stored transposed (D, C)
        "proj_wT": jax.random.normal(ks[0], (D, C), jnp.float32) * std,
        "proj_b": jnp.zeros((D, 1), jnp.float32),
        # query_embed: nn.Embedding(num_queries, hidden_dim)
        "query_embed": jax.random.normal(ks[1], (Q, D), jnp.float32) * std,
        # class_embed: Linear(D, num_classes + 1)
        "class_w": jax.random.normal(ks[2], (D, NUM_CLASSES + 1), jnp.float32) * std,
        "class_b": jnp.zeros((1, NUM_CLASSES + 1), jnp.float32),
        # bbox_embed: MLP(D, D, 4, num_layers=3)
        "mlp_w1": jax.random.normal(ks[3], (D, D), jnp.float32) * std,
        "mlp_b1": jnp.zeros((1, D), jnp.float32),
        "mlp_w2": jax.random.normal(ks[4], (D, D), jnp.float32) * std,
        "mlp_b2": jnp.zeros((1, D), jnp.float32),
        "mlp_w3": jax.random.normal(ks[5], (D, 4), jnp.float32) * std,
        "mlp_b3": jnp.zeros((1, 4), jnp.float32),
    }


def detr_forward(params, src, pos, mask_bias):
    """src: (B, C, H, W) backbone feature map (NCHW, like PyTorch).
    pos:  (B, D, H, W) sine positional encoding (precomputed constant).
    mask_bias: (B, 1, S) additive key-padding bias (precomputed constant)."""
    b, c, h, w = src.shape
    s = h * w
    src_cs = src.reshape(b, c, s)              # channel-major: S lane-dense
    pos_cs = pos.reshape(b, pos.shape[1], s)
    logits, boxes = detr_fused_pallas(src_cs, pos_cs, mask_bias, params)
    return {"pred_logits": logits, "pred_boxes": boxes}


def detr_reference(params, src, pos, mask_bias):
    """Pure-JAX reference for correctness checking."""
    b, c, h, w = src.shape
    s = h * w
    x = src.reshape(b, c, s)
    mem_t = jnp.einsum("dc,bcs->bds", params["proj_wT"], x) + params["proj_b"][None]
    keys_t = mem_t + pos.reshape(b, D, s)
    q = params["query_embed"]
    sc = jnp.einsum("qd,bds->bqs", q, keys_t) / math.sqrt(D) + mask_bias
    sc = sc - sc.max(-1, keepdims=True)
    p = jnp.exp(sc)
    p = p / p.sum(-1, keepdims=True)
    hs = jnp.einsum("bqs,bds->bqd", p, mem_t)
    logits = hs @ params["class_w"] + params["class_b"]
    hh = jnp.maximum(hs @ params["mlp_w1"] + params["mlp_b1"], 0.0)
    hh = jnp.maximum(hh @ params["mlp_w2"] + params["mlp_b2"], 0.0)
    boxes = jax.nn.sigmoid(hh @ params["mlp_w3"] + params["mlp_b3"])
    return logits, boxes


# ------------------------------- main ----------------------------------------
if __name__ == "__main__":
    key = jax.random.PRNGKey(0)
    k_param, k_data = jax.random.split(key)
    params = init_params(k_param)
    x = jax.random.normal(k_data, (B, C, H, W), dtype=jnp.float32)

    # Constants for fixed shapes — hoisted out of the per-forward path.
    mask = jnp.zeros((B, H, W), dtype=bool)
    pos = position_embedding_sine(mask, D)                        # (B, D, H, W)
    mask_bias = jnp.where(mask.reshape(B, 1, S), -1e9, 0.0).astype(jnp.float32)

    out = detr_forward(params, x, pos, mask_bias)
    jax.block_until_ready(out)

    ref_logits, ref_boxes = detr_reference(params, x, pos, mask_bias)

    assert out["pred_logits"].shape == (B, Q, NUM_CLASSES + 1)
    assert out["pred_boxes"].shape == (B, Q, 4)
    assert bool(jnp.all(jnp.isfinite(out["pred_logits"])))
    assert bool(jnp.all((out["pred_boxes"] >= 0.0) & (out["pred_boxes"] <= 1.0)))
    # approx reciprocal in the softmax -> allow ~1e-3-level relative diffs
    assert bool(jnp.allclose(out["pred_logits"], ref_logits, atol=2e-2, rtol=2e-2))
    assert bool(jnp.allclose(out["pred_boxes"], ref_boxes, atol=2e-2, rtol=2e-2))
    print("KERNEL_OK")
</pallas_src>

<mosaic_0001>
module attributes {stable_mosaic.version = 11 : i64} {
  func.func @_detr_fused_kernel(%arg0: i32, %arg1: memref<1x4x256xf32, #tpu.memory_space<vmem>>, %arg2: memref<1x32x256xf32, #tpu.memory_space<vmem>>, %arg3: memref<1x1x256xf32, #tpu.memory_space<vmem>>, %arg4: memref<8x32xf32, #tpu.memory_space<vmem>>, %arg5: memref<32x4xf32, #tpu.memory_space<vmem>>, %arg6: memref<32x1xf32, #tpu.memory_space<vmem>>, %arg7: memref<32x5xf32, #tpu.memory_space<vmem>>, %arg8: memref<1x5xf32, #tpu.memory_space<vmem>>, %arg9: memref<32x32xf32, #tpu.memory_space<vmem>>, %arg10: memref<1x32xf32, #tpu.memory_space<vmem>>, %arg11: memref<32x32xf32, #tpu.memory_space<vmem>>, %arg12: memref<1x32xf32, #tpu.memory_space<vmem>>, %arg13: memref<32x4xf32, #tpu.memory_space<vmem>>, %arg14: memref<1x4xf32, #tpu.memory_space<vmem>>, %arg15: memref<1x8x5xf32, #tpu.memory_space<vmem>>, %arg16: memref<1x8x4xf32, #tpu.memory_space<vmem>>) attributes {dimension_semantics = [#tpu.dimension_semantics<parallel>], iteration_bounds = array<i64: 2>, scalar_prefetch = 0 : i64, scratch_operands = 0 : i64, tpu.core_type = #tpu.core_type<tc>, window_params = [{transform_indices = @transform_0, window_bounds = array<i64: 1, 4, 256>}, {transform_indices = @transform_1, window_bounds = array<i64: 1, 32, 256>}, {transform_indices = @transform_2, window_bounds = array<i64: 1, 1, 256>}, {pipeline_mode = #tpu.pipeline_mode<synchronous>, transform_indices = @transform_3, window_bounds = array<i64: 8, 32>}, {pipeline_mode = #tpu.pipeline_mode<synchronous>, transform_indices = @transform_4, window_bounds = array<i64: 32, 4>}, {pipeline_mode = #tpu.pipeline_mode<synchronous>, transform_indices = @transform_5, window_bounds = array<i64: 32, 1>}, {pipeline_mode = #tpu.pipeline_mode<synchronous>, transform_indices = @transform_6, window_bounds = array<i64: 32, 5>}, {pipeline_mode = #tpu.pipeline_mode<synchronous>, transform_indices = @transform_7, window_bounds = array<i64: 1, 5>}, {pipeline_mode = #tpu.pipeline_mode<synchronous>, transform_indices = @transform_8, window_bounds = array<i64: 32, 32>}, {pipeline_mode = #tpu.pipeline_mode<synchronous>, transform_indices = @transform_9, window_bounds = array<i64: 1, 32>}, {pipeline_mode = #tpu.pipeline_mode<synchronous>, transform_indices = @transform_10, window_bounds = array<i64: 32, 32>}, {pipeline_mode = #tpu.pipeline_mode<synchronous>, transform_indices = @transform_11, window_bounds = array<i64: 1, 32>}, {pipeline_mode = #tpu.pipeline_mode<synchronous>, transform_indices = @transform_12, window_bounds = array<i64: 32, 4>}, {pipeline_mode = #tpu.pipeline_mode<synchronous>, transform_indices = @transform_13, window_bounds = array<i64: 1, 4>}, {transform_indices = @transform_14, window_bounds = array<i64: 1, 8, 5>}, {transform_indices = @transform_15, window_bounds = array<i64: 1, 8, 4>}]} {
    %c0 = arith.constant 0 : index
    %c0_0 = arith.constant 0 : index
    %c0_1 = arith.constant 0 : index
    %0 = vector.load %arg1[%c0, %c0_0, %c0_1] : memref<1x4x256xf32, #tpu.memory_space<vmem>>, vector<1x4x256xf32>
    %1 = vector.shape_cast %0 : vector<1x4x256xf32> to vector<4x256xf32>
    %c0_2 = arith.constant 0 : index
    %c0_3 = arith.constant 0 : index
    %2 = vector.load %arg5[%c0_2, %c0_3] : memref<32x4xf32, #tpu.memory_space<vmem>>, vector<32x4xf32>
    %cst = arith.constant dense<0.000000e+00> : vector<32x256xf32>
    %3 = tpu.matmul %2, %1, %cst {dimension_numbers = #tpu.dot_dimension_numbers<[1], [0], [0], [1], [0, 0, 1, 1], [], []>} : vector<32x4xf32>, vector<4x256xf32>, vector<32x256xf32> -> vector<32x256xf32>
    %c0_4 = arith.constant 0 : index
    %c0_5 = arith.constant 0 : index
    %4 = vector.load %arg6[%c0_4, %c0_5] : memref<32x1xf32, #tpu.memory_space<vmem>>, vector<32x1xf32>
    %5 = vector.broadcast %4 : vector<32x1xf32> to vector<32x256xf32>
    %6 = arith.addf %3, %5 : vector<32x256xf32>
    %c0_6 = arith.constant 0 : index
    %c0_7 = arith.constant 0 : index
    %c0_8 = arith.constant 0 : index
    %7 = vector.load %arg2[%c0_6, %c0_7, %c0_8] : memref<1x32x256xf32, #tpu.memory_space<vmem>>, vector<1x32x256xf32>
    %8 = vector.shape_cast %7 : vector<1x32x256xf32> to vector<32x256xf32>
    %9 = arith.addf %6, %8 : vector<32x256xf32>
    %c0_9 = arith.constant 0 : index
    %c0_10 = arith.constant 0 : index
    %10 = vector.load %arg4[%c0_9, %c0_10] : memref<8x32xf32, #tpu.memory_space<vmem>>, vector<8x32xf32>
    %cst_11 = arith.constant dense<0.000000e+00> : vector<8x256xf32>
    %11 = tpu.matmul %10, %9, %cst_11 {dimension_numbers = #tpu.dot_dimension_numbers<[1], [0], [0], [1], [0, 0, 1, 1], [], []>} : vector<8x32xf32>, vector<32x256xf32>, vector<8x256xf32> -> vector<8x256xf32>
    %cst_12 = arith.constant 0.176776692 : f32
    %12 = vector.broadcast %cst_12 : f32 to vector<8x256xf32>
    %13 = arith.mulf %11, %12 : vector<8x256xf32>
    %c0_13 = arith.constant 0 : index
    %c0_14 = arith.constant 0 : index
    %c0_15 = arith.constant 0 : index
    %14 = vector.load %arg3[%c0_13, %c0_14, %c0_15] : memref<1x1x256xf32, #tpu.memory_space<vmem>>, vector<1x1x256xf32>
    %15 = vector.shape_cast %14 : vector<1x1x256xf32> to vector<1x256xf32>
    %16 = vector.broadcast %15 : vector<1x256xf32> to vector<8x256xf32>
    %17 = arith.addf %13, %16 : vector<8x256xf32>
    %cst_16 = arith.constant dense<0xFF800000> : vector<8xf32>
    %18 = vector.multi_reduction <maximumf>, %17, %cst_16 [1] : vector<8x256xf32> to vector<8xf32>
    %19 = vector.shape_cast %18 : vector<8xf32> to vector<8x1xf32>
    %20 = vector.broadcast %19 : vector<8x1xf32> to vector<8x256xf32>
    %21 = arith.subf %17, %20 : vector<8x256xf32>
    %22 = math.exp %21 : vector<8x256xf32>
    %cst_17 = arith.constant dense<0.000000e+00> : vector<8xf32>
    %23 = vector.multi_reduction <add>, %22, %cst_17 [1] : vector<8x256xf32> to vector<8xf32>
    %24 = vector.shape_cast %23 : vector<8xf32> to vector<8x1xf32>
    %25 = tpu.reciprocal %24 {approx = true} : vector<8x1xf32> -> vector<8x1xf32>
    %26 = vector.broadcast %25 : vector<8x1xf32> to vector<8x256xf32>
    %27 = arith.mulf %22, %26 : vector<8x256xf32>
    %cst_18 = arith.constant dense<0.000000e+00> : vector<8x32xf32>
    %28 = tpu.matmul %27, %6, %cst_18 {dimension_numbers = #tpu.dot_dimension_numbers<[1], [1], [0], [0], [0, 0, 1, 0], [], []>} : vector<8x256xf32>, vector<32x256xf32>, vector<8x32xf32> -> vector<8x32xf32>
    %c0_19 = arith.constant 0 : index
    %c0_20 = arith.constant 0 : index
    %29 = vector.load %arg7[%c0_19, %c0_20] : memref<32x5xf32, #tpu.memory_space<vmem>>, vector<32x5xf32>
    %cst_21 = arith.constant dense<0.000000e+00> : vector<8x5xf32>
    %30 = tpu.matmul %28, %29, %cst_21 {dimension_numbers = #tpu.dot_dimension_numbers<[1], [0], [0], [1], [0, 0, 1, 1], [], []>} : vector<8x32xf32>, vector<32x5xf32>, vector<8x5xf32> -> vector<8x5xf32>
    %c0_22 = arith.constant 0 : index
    %c0_23 = arith.constant 0 : index
    %31 = vector.load %arg8[%c0_22, %c0_23] : memref<1x5xf32, #tpu.memory_space<vmem>>, vector<1x5xf32>
    %32 = vector.broadcast %31 : vector<1x5xf32> to vector<8x5xf32>
    %33 = arith.addf %30, %32 : vector<8x5xf32>
    %c0_24 = arith.constant 0 : index
    %c0_25 = arith.constant 0 : index
    %c0_26 = arith.constant 0 : index
    %34 = vector.load %arg15[%c0_24, %c0_25, %c0_26] : memref<1x8x5xf32, #tpu.memory_space<vmem>>, vector<1x8x5xf32>
    %35 = vector.shape_cast %34 : vector<1x8x5xf32> to vector<8x5xf32>
    %36 = vector.shape_cast %33 : vector<8x5xf32> to vector<1x8x5xf32>
    tpu.vector_store %arg15[%c0_24, %c0_25, %c0_26], %36 {strides = array<i32>} : memref<1x8x5xf32, #tpu.memory_space<vmem>>, vector<1x8x5xf32>,
    %c0_27 = arith.constant 0 : index
    %c0_28 = arith.constant 0 : index
    %37 = vector.load %arg9[%c0_27, %c0_28] : memref<32x32xf32, #tpu.memory_space<vmem>>, vector<32x32xf32>
    %cst_29 = arith.constant dense<0.000000e+00> : vector<8x32xf32>
    %38 = tpu.matmul %28, %37, %cst_29 {dimension_numbers = #tpu.dot_dimension_numbers<[1], [0], [0], [1], [0, 0, 1, 1], [], []>} : vector<8x32xf32>, vector<32x32xf32>, vector<8x32xf32> -> vector<8x32xf32>
    %c0_30 = arith.constant 0 : index
    %c0_31 = arith.constant 0 : index
    %39 = vector.load %arg10[%c0_30, %c0_31] : memref<1x32xf32, #tpu.memory_space<vmem>>, vector<1x32xf32>
    %40 = vector.broadcast %39 : vector<1x32xf32> to vector<8x32xf32>
    %41 = arith.addf %38, %40 : vector<8x32xf32>
    %cst_32 = arith.constant 0.000000e+00 : f32
    %42 = vector.broadcast %cst_32 : f32 to vector<8x32xf32>
    %43 = arith.maximumf %41, %42 : vector<8x32xf32>
    %c0_33 = arith.constant 0 : index
    %c0_34 = arith.constant 0 : index
    %44 = vector.load %arg11[%c0_33, %c0_34] : memref<32x32xf32, #tpu.memory_space<vmem>>, vector<32x32xf32>
    %cst_35 = arith.constant dense<0.000000e+00> : vector<8x32xf32>
    %45 = tpu.matmul %43, %44, %cst_35 {dimension_numbers = #tpu.dot_dimension_numbers<[1], [0], [0], [1], [0, 0, 1, 1], [], []>} : vector<8x32xf32>, vector<32x32xf32>, vector<8x32xf32> -> vector<8x32xf32>
    %c0_36 = arith.constant 0 : index
    %c0_37 = arith.constant 0 : index
    %46 = vector.load %arg12[%c0_36, %c0_37] : memref<1x32xf32, #tpu.memory_space<vmem>>, vector<1x32xf32>
    %47 = vector.broadcast %46 : vector<1x32xf32> to vector<8x32xf32>
    %48 = arith.addf %45, %47 : vector<8x32xf32>
    %cst_38 = arith.constant 0.000000e+00 : f32
    %49 = vector.broadcast %cst_38 : f32 to vector<8x32xf32>
    %50 = arith.maximumf %48, %49 : vector<8x32xf32>
    %c0_39 = arith.constant 0 : index
    %c0_40 = arith.constant 0 : index
    %51 = vector.load %arg13[%c0_39, %c0_40] : memref<32x4xf32, #tpu.memory_space<vmem>>, vector<32x4xf32>
    %cst_41 = arith.constant dense<0.000000e+00> : vector<8x4xf32>
    %52 = tpu.matmul %50, %51, %cst_41 {dimension_numbers = #tpu.dot_dimension_numbers<[1], [0], [0], [1], [0, 0, 1, 1], [], []>} : vector<8x32xf32>, vector<32x4xf32>, vector<8x4xf32> -> vector<8x4xf32>
    %c0_42 = arith.constant 0 : index
    %c0_43 = arith.constant 0 : index
    %53 = vector.load %arg14[%c0_42, %c0_43] : memref<1x4xf32, #tpu.memory_space<vmem>>, vector<1x4xf32>
    %54 = vector.broadcast %53 : vector<1x4xf32> to vector<8x4xf32>
    %55 = arith.addf %52, %54 : vector<8x4xf32>
    %cst_44 = arith.constant 0.000000e+00 : f32
    %56 = vector.broadcast %cst_44 : f32 to vector<8x4xf32>
    %57 = arith.subf %56, %55 : vector<8x4xf32>
    %58 = math.exp %57 : vector<8x4xf32>
    %cst_45 = arith.constant 1.000000e+00 : f32
    %59 = vector.broadcast %cst_45 : f32 to vector<8x4xf32>
    %60 = arith.addf %59, %58 : vector<8x4xf32>
    %cst_46 = arith.constant 1.000000e+00 : f32
    %61 = vector.broadcast %cst_46 : f32 to vector<8x4xf32>
    %62 = arith.divf %61, %60 : vector<8x4xf32>
    %c0_47 = arith.constant 0 : index
    %c0_48 = arith.constant 0 : index
    %c0_49 = arith.constant 0 : index
    %63 = vector.load %arg16[%c0_47, %c0_48, %c0_49] : memref<1x8x4xf32, #tpu.memory_space<vmem>>, vector<1x8x4xf32>
    %64 = vector.shape_cast %63 : vector<1x8x4xf32> to vector<8x4xf32>
    %65 = vector.shape_cast %62 : vector<8x4xf32> to vector<1x8x4xf32>
    tpu.vector_store %arg16[%c0_47, %c0_48, %c0_49], %65 {strides = array<i32>} : memref<1x8x4xf32, #tpu.memory_space<vmem>>, vector<1x8x4xf32>,
    return
  }
  func.func @transform_0(%arg0: i32) -> (i32, i32, i32) {
    %c0_i32 = arith.constant 0 : i32
    %c0_i32_0 = arith.constant 0 : i32
    %c0_i32_1 = arith.constant 0 : i32
    return %arg0, %c0_i32, %c0_i32_0 : i32, i32, i32
  }
  func.func @transform_1(%arg0: i32) -> (i32, i32, i32) {
    %c0_i32 = arith.constant 0 : i32
    %c0_i32_0 = arith.constant 0 : i32
    %c0_i32_1 = arith.constant 0 : i32
    return %arg0, %c0_i32, %c0_i32_0 : i32, i32, i32
  }
  func.func @transform_2(%arg0: i32) -> (i32, i32, i32) {
    %c0_i32 = arith.constant 0 : i32
    %c0_i32_0 = arith.constant 0 : i32
    %c0_i32_1 = arith.constant 0 : i32
    return %arg0, %c0_i32, %c0_i32_0 : i32, i32, i32
  }
  func.func @transform_3(%arg0: i32) -> (i32, i32) {
    %c0_i32 = arith.constant 0 : i32
    %c0_i32_0 = arith.constant 0 : i32
    %c0_i32_1 = arith.constant 0 : i32
    return %c0_i32, %c0_i32_0 : i32, i32
  }
  func.func @transform_4(%arg0: i32) -> (i32, i32) {
    %c0_i32 = arith.constant 0 : i32
    %c0_i32_0 = arith.constant 0 : i32
    %c0_i32_1 = arith.constant 0 : i32
    return %c0_i32, %c0_i32_0 : i32, i32
  }
  func.func @transform_5(%arg0: i32) -> (i32, i32) {
    %c0_i32 = arith.constant 0 : i32
    %c0_i32_0 = arith.constant 0 : i32
    %c0_i32_1 = arith.constant 0 : i32
    return %c0_i32, %c0_i32_0 : i32, i32
  }
  func.func @transform_6(%arg0: i32) -> (i32, i32) {
    %c0_i32 = arith.constant 0 : i32
    %c0_i32_0 = arith.constant 0 : i32
    %c0_i32_1 = arith.constant 0 : i32
    return %c0_i32, %c0_i32_0 : i32, i32
  }
  func.func @transform_7(%arg0: i32) -> (i32, i32) {
    %c0_i32 = arith.constant 0 : i32
    %c0_i32_0 = arith.constant 0 : i32
    %c0_i32_1 = arith.constant 0 : i32
    return %c0_i32, %c0_i32_0 : i32, i32
  }
  func.func @transform_8(%arg0: i32) -> (i32, i32) {
    %c0_i32 = arith.constant 0 : i32
    %c0_i32_0 = arith.constant 0 : i32
    %c0_i32_1 = arith.constant 0 : i32
    return %c0_i32, %c0_i32_0 : i32, i32
  }
  func.func @transform_9(%arg0: i32) -> (i32, i32) {
    %c0_i32 = arith.constant 0 : i32
    %c0_i32_0 = arith.constant 0 : i32
    %c0_i32_1 = arith.constant 0 : i32
    return %c0_i32, %c0_i32_0 : i32, i32
  }
  func.func @transform_10(%arg0: i32) -> (i32, i32) {
    %c0_i32 = arith.constant 0 : i32
    %c0_i32_0 = arith.constant 0 : i32
    %c0_i32_1 = arith.constant 0 : i32
    return %c0_i32, %c0_i32_0 : i32, i32
  }
  func.func @transform_11(%arg0: i32) -> (i32, i32) {
    %c0_i32 = arith.constant 0 : i32
    %c0_i32_0 = arith.constant 0 : i32
    %c0_i32_1 = arith.constant 0 : i32
    return %c0_i32, %c0_i32_0 : i32, i32
  }
  func.func @transform_12(%arg0: i32) -> (i32, i32) {
    %c0_i32 = arith.constant 0 : i32
    %c0_i32_0 = arith.constant 0 : i32
    %c0_i32_1 = arith.constant 0 : i32
    return %c0_i32, %c0_i32_0 : i32, i32
  }
  func.func @transform_13(%arg0: i32) -> (i32, i32) {
    %c0_i32 = arith.constant 0 : i32
    %c0_i32_0 = arith.constant 0 : i32
    %c0_i32_1 = arith.constant 0 : i32
    return %c0_i32, %c0_i32_0 : i32, i32
  }
  func.func @transform_14(%arg0: i32) -> (i32, i32, i32) {
    %c0_i32 = arith.constant 0 : i32
    %c0_i32_0 = arith.constant 0 : i32
    %c0_i32_1 = arith.constant 0 : i32
    return %arg0, %c0_i32, %c0_i32_0 : i32, i32, i32
  }
  func.func @transform_15(%arg0: i32) -> (i32, i32, i32) {
    %c0_i32 = arith.constant 0 : i32
    %c0_i32_0 = arith.constant 0 : i32
    %c0_i32_1 = arith.constant 0 : i32
    return %arg0, %c0_i32, %c0_i32_0 : i32, i32, i32
  }
}

</mosaic_0001>

<bundles_post_ra>
// kernel: tpu_custom_call.1
= control target key start
LH: loop header
LB: loop body
LE: loop exit
PB: predicated region body
PF: predicated region fallthrough
CT: control target
= control target key end

     0   :  { %s2393_s0 = inlined_call_operand.hbm [shape: f32[2,4,256], index: 0, kind: input, shape index: {}]   ;;  %s2394_s1 = inlined_call_operand.vmem [shape: f32[2,32,256], index: 1, kind: input, shape index: {}]   ;;  %s2395_s2 = inlined_call_operand.hbm [shape: f32[2,1,256], index: 2, kind: input, shape index: {}]   ;;  %s2396_s3 = inlined_call_operand.hbm [shape: f32[8,32], index: 3, kind: input, shape index: {}]   ;;  %s2397_s4 = inlined_call_operand.vmem [shape: f32[32,4], index: 4, kind: input, shape index: {}]   ;;  %s2398_s5 = inlined_call_operand.vmem [shape: f32[32,1], index: 5, kind: input, shape index: {}]   ;;  %s2399_s6 = inlined_call_operand.vmem [shape: f32[32,5], index: 6, kind: input, shape index: {}]   ;;  %s2400_s7 = inlined_call_operand.hbm [shape: f32[1,5], index: 7, kind: input, shape index: {}]   ;;  %s2401_s8 = inlined_call_operand.hbm [shape: f32[32,32], index: 8, kind: input, shape index: {}]   ;;  %s2402_s9 = inlined_call_operand.hbm [shape: f32[1,32], index: 9, kind: input, shape index: {}]   ;;  %s2403_s10 = inlined_call_operand.vmem [shape: f32[32,32], index: 10, kind: input, shape index: {}]   ;;  %s2404_s11 = inlined_call_operand.hbm [shape: f32[1,32], index: 11, kind: input, shape index: {}]   ;;  %s2405_s12 = inlined_call_operand.vmem [shape: f32[32,4], index: 12, kind: input, shape index: {}]   ;;  %s2406_s13 = inlined_call_operand.vmem [shape: f32[1,4], index: 13, kind: input, shape index: {}]   ;;  %s2407_s14 = inlined_call_operand.vmem [shape: f32[2,8,5], index: 14, kind: output, shape index: {0}]   ;;  %s2408_s15 = inlined_call_operand.vmem [shape: f32[2,8,4], index: 15, kind: output, shape index: {1}]  }
   0x1   :  { %2412 = sst [smem:[#allocation18_spill]] %s2393_s0 }
   0x2   :  { %2413 = sst [smem:[#allocation19_spill]] %s2396_s3 }
   0x3   :  { %2414 = sst [smem:[#allocation20_spill]] %s2400_s7 }
   0x4   :  { %2415 = sst [smem:[#allocation21_spill]] %s2401_s8 }
   0x5   :  { %2416 = sst [smem:[#allocation22_spill]] %s2402_s9 }
   0x6   :  { %2417 = sst [smem:[#allocation23_spill]] %s2406_s13 }
   0x7   :  { %2418 = sst [smem:[#allocation24_spill]] %s2407_s14 }
   0x8   :  { %2419 = sst [smem:[#allocation25_spill]] %s2408_s15 }
   0x9   :  { %21 = vsyncpa [#allocation3], 0 }
   0xa   :  { %23 = vsyncpa [#allocation3 + $0x1], 0 }
   0xb   :  { %24 = vsyncpa [#allocation5], 0 }
   0xc   :  { %26 = vsyncpa [#allocation5 + $0x1], 0 }
   0xd   :  { %27 = vsyncpa [#allocation8], 0 }
   0xe   :  { %28 = vsyncpa [#allocation11], 0  ;;  %s2050_s18 = smov 0   ;;  %s2052_s19 = smov 0  }
   0xf   :  { %s2054_s20 = smov 0   ;;  %s2056_s21 = smov 0  }
  0x10 LB: > { %s1958_s22 = smov [#allocation6]   ;;  %s2071_s24 = sadd.s32 4294967295, %s1956_s21   ;;  %s1956_s21 = sphi %s2056_s21, %s2447_s21   ;;  %s1952_s20 = sphi %s2054_s20, %s2446_s20   ;;  %s1948_s19 = sphi %s2052_s19, %s2445_s19   ;;  %s1944_s18 = sphi %s2050_s18, %s2444_s18  }
  0x11   : > { %s413_s23 = sshll.u32 %s1958_s22, 4  ;;  %p1498_p0 = scmp.ge.s32.totalorder %s1956_s21, 1  ;;  %s414_s23 = int_to_ptr.vmem [resolvable:$true] %s413_s23 }
  0x12   : > { %p2409_p1 = scmp.eq.s32.totalorder %s2071_s24, 0  ;;  %p400_p2 = scmp.lt.s32.totalorder %s1956_s21, 3 }
  0x13   : > { %s1959_s26 = smov [#allocation7]   ;;  %s1960_s28 = smov [#allocation10]  }
  0x14   : > { %p2076_p3 = pnand %p1498_p0, %p400_p2  ;;  %s433_s27 = sshll.u32 %s1959_s26, 4  ;;  %s434_s27 = int_to_ptr.vmem [resolvable:$true] %s433_s27 }
  0x15   : > { %s457_s29 = sshll.u32 %s1960_s28, 4  ;;  %s1961_s16 = smov [#allocation9]   ;;  %s2088_s29 = int_to_ptr.vmem [resolvable:$true] %s457_s29 }
  0x16   : > { %s2420_s25 = scalar_select %p2076_p3, 1, 0 }
  0x17   : > { %p1631_p4 = pneg %p2076_p3  ;;  %s2090_s17 = sshll.u32 %s1961_s16, 4  ;;  %s444_s17 = int_to_ptr.vmem [resolvable:$true] %s2090_s17 }
  0x18   : > { %s1731_s26 = scalar_lea.vmem %s414_s23, 128  ;;  %p1739_p10 = scmp.lt.s32.totalorder %s414_s23, %s414_s23 }
  0x19   : > { %p2084_p5 = pnand %p1631_p4, %p2409_p1  ;;  %p1732_p7 = scmp.ne.s32.totalorder %s414_s23, %s1731_s26 }
  0x1a   : > { %p1740_p11 = scmp.lt.s32.totalorder %s1731_s26, %s1731_s26 }
  0x1b   : > { %p2094_p6 = pneg %p2084_p5 }
  0x1c   : > { %p1741_p12 = por %p1740_p11, %p1739_p10 }
  0x1d   : > { %p1734_p8 = pnand %p1732_p7, %p2094_p6 }
  0x1f   : > { %p1735_p9 = pneg %p1734_p8 }
  0x21   : > { %p1742_p13 = pnand %p1741_p12, %p1735_p9 }
  0x23   : > { %1745 = shalt.err (!%p1742_p13)
}
  0x24   : > { %s2423_s3 = sld [smem:[#allocation19_spill]]  ;;  %s1757_s15 = scalar_lea.vmem %s434_s27, 16 }
  0x25   : > { %p1758_p0 = scmp.ne.s32.totalorder %s434_s27, %s1757_s15  ;;  %s1764_s13 = scalar_lea.vmem %s434_s27, 32 }
  0x26   : > { %p1765_p7 = scmp.lt.s32.totalorder %s434_s27, %s434_s27  ;;  %p1766_p8 = scmp.lt.s32.totalorder %s1764_s13, %s1757_s15 }
  0x27   : > { %p1760_p2 = pnand %p1758_p0, %p2094_p6 }
  0x28   : > { %p1767_p1 = por %p1766_p8, %p1765_p7 }
  0x29   : > { %p1761_p4 = pneg %p1760_p2 }
  0x2a   : > { %1634 = dma.hbm_to_vmem [thread:$0]  (!%p2084_p5), %s2423_s3, 128, %s414_s23, [#allocation5]  }
  0x2b   : > { %p1768_p3 = pnand %p1767_p1, %p1761_p4 }
  0x2d   : > { %1771 = shalt.err (!%p1768_p3)
}
  0x2e   : > { %s2424_s7 = sld [smem:[#allocation20_spill]]  ;;  %s1783_s23 = scalar_lea.vmem %s2088_s29, 16 }
  0x2f   : > { %p1784_p9 = scmp.ne.s32.totalorder %s2088_s29, %s1783_s23  ;;  %s1790_s13 = scalar_lea.vmem %s2088_s29, 32 }
  0x30   : > { %p1791_p1 = scmp.lt.s32.totalorder %s2088_s29, %s2088_s29  ;;  %p1792_p3 = scmp.lt.s32.totalorder %s1790_s13, %s1783_s23 }
  0x31   : > { %p1786_p10 = pnand %p1784_p9, %p2094_p6 }
  0x32   : > { %p1793_p12 = por %p1792_p3, %p1791_p1 }
  0x33   : > { %p1787_p11 = pneg %p1786_p10 }
  0x34   : > { %1637 = dma.hbm_to_vmem [thread:$0]  (!%p2084_p5), %s2424_s7, 16, %s434_s27, [#allocation8]  }
  0x35   : > { %p1794_p13 = pnand %p1793_p12, %p1787_p11 }
  0x37   : > { %1797 = shalt.err (!%p1794_p13)
}
  0x38   : > { %s2425_s9 = sld [smem:[#allocation22_spill]]  ;;  %s1809_s27 = scalar_lea.vmem %s444_s17, 512 }
  0x39   : > { %p1810_p0 = scmp.ne.s32.totalorder %s444_s17, %s1809_s27  ;;  %p1817_p7 = scmp.lt.s32.totalorder %s444_s17, %s444_s17 }
  0x3a   : > { %p1818_p8 = scmp.lt.s32.totalorder %s1809_s27, %s1809_s27 }
  0x3b   : > { %p1812_p2 = pnand %p1810_p0, %p2094_p6 }
  0x3c   : > { %p1819_p9 = por %p1818_p8, %p1817_p7 }
  0x3d   : > { %p1813_p4 = pneg %p1812_p2 }
  0x3e   : > { %1643 = dma.hbm_to_vmem [thread:$0]  (!%p2084_p5), %s2425_s9, 16, %s2088_s29, [#allocation11]  }
  0x3f   : > { %p1820_p10 = pnand %p1819_p9, %p1813_p4 }
  0x41   : > { %1823 = shalt.err (!%p1820_p10)
}
  0x42   : > { %s1962_s28 = smov 128   ;;  %s1963_s16 = smov 8  }
  0x43   : > { %s2426_s8 = sld [smem:[#allocation21_spill]]  ;;  %s1964_s29 = smov [#allocation12]  }
  0x44   : > { %s471_s13 = sshll.u32 %s1964_s29, 4  ;;  %s472_s13 = int_to_ptr.vmem [resolvable:$true] %s471_s13 }
  0x45   : > { %s1835_s14 = scalar_lea.vmem %s472_s13, 16  ;;  %s1842_s15 = scalar_lea.vmem %s472_s13, 32 }
  0x46   : > { %p1836_p11 = scmp.ne.s32.totalorder %s472_s13, %s1835_s14  ;;  %p1843_p12 = scmp.lt.s32.totalorder %s472_s13, %s472_s13 }
  0x47   : > { %p1844_p13 = scmp.lt.s32.totalorder %s1842_s15, %s1835_s14 }
  0x48   : > { %p1838_p1 = pnand %p1836_p11, %p2094_p6 }
  0x49   : > { %1640 = dma.hbm_to_vmem [thread:$0]  (!%p2084_p5), %s2426_s8, 512, %s444_s17, [#allocation8], %s1962_s28, %s1962_s28, %s1963_s16  }
  0x4a   : > { %p1839_p3 = pneg %p1838_p1  ;;  %p1845_p0 = por %p1844_p13, %p1843_p12 }
  0x4c   : > { %p1846_p2 = pnand %p1845_p0, %p1839_p3 }
  0x4e   : > { %1849 = shalt.err (!%p1846_p2)
}
  0x4f   : > { %1646 = dma.hbm_to_vmem [thread:$0]  (!%p2084_p5), %s2404_s11, 16, %s472_s13, [#allocation11]  }
  0x50   : > { %s2141_s17 = sadd.s32 1, %s1956_s21   ;;  %s41_s22 = sadd.s32 1, %s1952_s20 }
  0x51   : > { %s38_s30 = ssub.s32 %s1956_s21, %s2141_s17  ;;  %p48_p4 = scmp.ne.s32.totalorder %s1952_s20, %s1948_s19 }
  0x52   : > { %p39_p6 = scmp.eq.s32.totalorder %s38_s30, 0  ;;  %p49_p7 = scmp.eq.s32.totalorder %s1956_s21, 0 }
  0x53   : > { %p54_p8 = scmp.ne.s32.totalorder %s1948_s19, %s1944_s18  ;;  %p2427_p10 = scmp.eq.s32.totalorder %s2071_s24, 0 }
  0x54   : > { %s2152_s3 = scalar_select %p39_p6, %s1952_s20, %s41_s22  }
  0x55   : > { %p50_p9 = por %p49_p7, %p48_p4  ;;  %p2156_p11 = por %p2427_p10, %p54_p8 }
  0x56   : > { %p1659_p1 = scmp.lt.s32.totalorder %s1956_s21, 2  ;;  %s2162_s16 = sand.u32 1, %s1952_s20  }
  0x57   : > { %s2428_s28 = scalar_select %p2156_p11, 1, 0 }
  0x58   : > { %s1505_s26 = sshll.u32 %s2162_s16, 3  ;;  %s1540_s23 = sshll.u32 %s1956_s21, 7 }
  0x59   : > { %s2429_s0 = sld [smem:[#allocation18_spill]]  ;;  %s492_s14 = scalar_lea.vmem [#allocation2], %s1505_s26 }
  0x5a   : > { %s500_s15 = sshll.u32 %s492_s14, 4  ;;  %p2173_p5 = pnand %p1659_p1, %p50_p9  ;;  %s2171_s15 = int_to_ptr.vmem [resolvable:$true] %s500_s15 }
  0x5b   : > { %s489_s7 = scalar_lea.sflag [#allocation3], %s2162_s16 }
  0x5c   : > { %p1852_p12 = pneg %p2173_p5 }
  0x5f   : > { %s2169_s18 = scalar_lea.hbm %s2429_s0, %s1540_s23  ;;  %s1855_s29 = scalar_lea.hbm %s2429_s0, 256 }
  0x60   : > { %s1850_s8 = scalar_lea.hbm %s2169_s18, 128  ;;  %p1856_p2 = scmp.lt.s32.totalorder %s2169_s18, %s2429_s0 }
  0x61   : > { %p1851_p3 = scmp.ne.s32.totalorder %s2169_s18, %s1850_s8  ;;  %p1857_p6 = scmp.lt.s32.totalorder %s1855_s29, %s1850_s8 }
  0x63   : > { %p1853_p13 = pnand %p1852_p12, %p1851_p3  ;;  %p1858_p4 = por %p1857_p6, %p1856_p2 }
  0x65   : > { %p1854_p0 = pneg %p1853_p13 }
  0x67   : > { %p1859_p7 = pnand %p1858_p4, %p1854_p0 }
  0x69   : > { %1862 = shalt.err (!%p1859_p7)
}
  0x6a   : > { %s1863_s30 = scalar_lea.vmem %s2171_s15, 128  ;;  %s1965_s26 = smov [#allocation2]  }
  0x6b   : > { %p1864_p8 = scmp.ne.s32.totalorder %s2171_s15, %s1863_s30  ;;  %s1868_s23 = sshll.u32 %s1965_s26, 4  ;;  %s1869_s23 = int_to_ptr.vmem [resolvable:$false] %s1868_s23 }
  0x6c   : > { %s1870_s22 = scalar_lea.vmem %s1869_s23, 256  ;;  %p1871_p1 = scmp.lt.s32.totalorder %s2171_s15, %s1869_s23 }
  0x6d   : > { %p1866_p9 = pnand %p1864_p8, %p1852_p12  ;;  %p1872_p3 = scmp.lt.s32.totalorder %s1870_s22, %s1863_s30 }
  0x6f   : > { %p1867_p10 = pneg %p1866_p9  ;;  %p1873_p13 = por %p1872_p3, %p1871_p1 }
  0x71   : > { %p1874_p2 = pnand %p1873_p13, %p1867_p10 }
  0x73   : > { %1877 = shalt.err (!%p1874_p2)
}
  0x74   : > { %1650 = dma.hbm_to_vmem [thread:$0]  (!%p2173_p5), %s2169_s18, 128, %s2171_s15, %s489_s7  }
  0x75   : > { %s1541_s8 = sshll.u32 %s1956_s21, 5  ;;  %s2431_s26 = sshll.u32 %s2162_s16, 1 }
  0x76   : > { %s2208_s14 = scalar_lea.hbm %s2395_s2, %s1541_s8  ;;  %s519_s30 = scalar_lea.vmem [#allocation4], %s2431_s26 }
  0x77   : > { %s527_s22 = sshll.u32 %s519_s30, 4  ;;  %s2432_s23 = sand.u32 1, %s1956_s21   ;;  %s528_s22 = int_to_ptr.vmem [resolvable:$true] %s527_s22 }
  0x78   : > { %s516_s0 = scalar_lea.sflag [#allocation5], %s2432_s23  ;;  %s1878_s9 = scalar_lea.hbm %s2208_s14, 32 }
  0x79   : > { %p1879_p0 = scmp.ne.s32.totalorder %s2208_s14, %s1878_s9  ;;  %s1883_s15 = scalar_lea.hbm %s2395_s2, 64 }
  0x7a   : > { %p1884_p7 = scmp.lt.s32.totalorder %s2208_s14, %s2395_s2  ;;  %p1885_p8 = scmp.lt.s32.totalorder %s1883_s15, %s1878_s9 }
  0x7b   : > { %p1881_p6 = pnand %p1879_p0, %p1852_p12 }
  0x7c   : > { %p1886_p9 = por %p1885_p8, %p1884_p7 }
  0x7d   : > { %p1882_p4 = pneg %p1881_p6 }
  0x7f   : > { %p1887_p10 = pnand %p1886_p9, %p1882_p4 }
  0x81   : > { %1890 = shalt.err (!%p1887_p10)
}
  0x82   : > { %s1891_s21 = scalar_lea.vmem %s528_s22, 32  ;;  %s1966_s29 = smov [#allocation4]  }
  0x83   : > { %p1892_p1 = scmp.ne.s32.totalorder %s528_s22, %s1891_s21  ;;  %s1896_s13 = sshll.u32 %s1966_s29, 4  ;;  %s1897_s13 = int_to_ptr.vmem [resolvable:$false] %s1896_s13 }
  0x84   : > { %s1898_s26 = scalar_lea.vmem %s1897_s13, 64  ;;  %p1899_p2 = scmp.lt.s32.totalorder %s528_s22, %s1897_s13 }
  0x85   : > { %p1894_p3 = pnand %p1892_p1, %p1852_p12  ;;  %p1900_p0 = scmp.lt.s32.totalorder %s1898_s26, %s1891_s21 }
  0x87   : > { %p1895_p13 = pneg %p1894_p3  ;;  %p1901_p6 = por %p1900_p0, %p1899_p2 }
  0x89   : > { %p1902_p11 = pnand %p1901_p6, %p1895_p13 }
  0x8b   : > { %1905 = shalt.err (!%p1902_p11)
}
  0x8c   : > { %1653 = dma.hbm_to_vmem [thread:$0]  (!%p2173_p5), %s2208_s14, 32, %s528_s22, %s516_s0  }
  0x8d   : > { %p2433_p4 = scmp.ne.s32.totalorder %s2420_s25, 0 }
  0x8e   : > { %s538_s9 = sand.u32 (!%p2433_p4), 1, %s1948_s19   ;;  %p2434_p12 = scmp.ne.s32.totalorder (!%p2433_p4), %s2428_s28, 0 }
  0x8f   : > { %536 = sbr.rel (%p2433_p4) target bundleno = 1726 (0x6be), region = 76  ;;  %s1512_s30 = sshll.u32 (!%p2433_p4), %s538_s9, 3 }
  0x90   : > { %s539_s23 = scalar_lea.sflag (!%p2433_p4), [#allocation3], %s538_s9  ;;  %s542_s7 = scalar_lea.vmem (!%p2433_p4), [#allocation2], %s1512_s30 }
  0x94   : > { %1923 = dma.done.wait (%p2434_p12), %s539_s23, 128  }
  0x95   : > { %1925 = vsyncadd (%p2434_p12), %s539_s23, 4294967168  ;;  %s547_s18 = sand.u32 1, %s2071_s24   ;;  %s1513_s27 = sshll.u32 %s538_s9, 1 }
  0x96   : > { %s548_s15 = scalar_lea.sflag [#allocation5], %s547_s18  ;;  %s2240_s0 = scalar_lea.vmem [#allocation4], %s1513_s27 }
  0x97   : > { %1927 = dma.done.wait (%p2434_p12), %s548_s15, 32  }
  0x98   : > { %1929 = vsyncadd (%p2434_p12), %s548_s15, 4294967264  ;;  %p2435_p11 = scmp.eq.s32.totalorder %s2071_s24, 0 }
  0x9a   : > { %1931 = dma.done.wait (%p2435_p11), [#allocation5], 128   ;;  %p2436_p5 = pmov %p2435_p11 }
  0x9c   : > { %1933 = vsyncadd (%p2436_p5), [#allocation5], 4294967168  ;;  %p2437_p7 = pmov %p2436_p5 }
  0x9d   : > { %p2438_p8 = pmov %p2436_p5 }
  0x9e   : > { %1935 = dma.done.wait (%p2437_p7), [#allocation8], 528  }
  0x9f   : > { %1937 = vsyncadd (%p2438_p8), [#allocation8], 4294966768  ;;  %p2439_p9 = pmov %p2436_p5 }
  0xa0   : > { %p2440_p10 = pmov %p2436_p5 }
  0xa1   : > { %1939 = dma.done.wait (%p2439_p9), [#allocation11], 32  }
  0xa2   : > { %1941 = vsyncadd (%p2440_p10), [#allocation11], 4294967264  ;;  %v1967_v0 = vmov 0.0   ;;  %v1968_v1 = vmov 0   ;;  %v644_v2 = vld [vmem:[%s542_s7] sm:$0xff]  ;;  %vm688_vm0 = vcmask 1043456   ;;  %v878_v49 = vlaneseq }
  0xa3   : > { %757 = vmatprep.mubr.f32.mxu0 %v1967_v0  ;;  %1708 = vset.pattern.permute.xlu1 %v1968_v1  ;;  %v674_v3 = vcombine.high %v644_v2, %v644_v2  ;;  %v650_v4 = vld [vmem:[%s2398_s5 + $0x8] sm:$0xff]  ;;  %v645_v5 = vld [vmem:[%s2397_s4] sm:$0xff]  ;;  %vm675_vm1 = vcmask 31744   ;;  %v652_v6 = vld [vmem:[%s2398_s5 + $0x18] sm:$0xff]  ;;  %p631_p1 = scmp.lt.s32.totalorder %s2071_s24, 1  ;;  %vm799_vm2 = vcmask 261120  }
  0xa4   : > { %1707 = vset.pattern.permute.xlu0 %v1968_v1  ;;  %867 = vmatprep.mubr.f32.mxu1 %v1967_v0  ;;  %v649_v7 = vld [vmem:[%s2398_s5] sm:$0xff]  ;;  %v651_v8 = vld [vmem:[%s2398_s5 + $0x10] sm:$0xff]  ;;  %v646_v9 = vld [vmem:[%s2397_s4 + $0x8] sm:$0xff]  ;;  %v879_v50 = vshrl.u32 %v878_v49, 7  ;;  %vm1969_vm3 = vmmov 0   ;;  %s2441_s16 = sld [smem:[#allocation24_spill]] }
  0xa5   : > { %660 = vperm.xlu1 %1708, %v650_v4   ;;  %1523 = vmatprep.subr.msk.mxu0 %vm688_vm0, %v674_v3  ;;  %v647_v10 = vld [vmem:[%s2397_s4 + $0x10] sm:$0xff]  ;;  %v648_v11 = vld [vmem:[%s2397_s4 + $0x18] sm:$0xff]  ;;  %s2449_s24 = smov (!%p631_p1, %s2071_s24), 1  ;;  %vm1059_vm4 = vcmask 39936   ;;  %s2442_s27 = sld [smem:[#allocation23_spill]] }
  0xa6   : > { %670 = vperm.xlu0 %1707, %v652_v6   ;;  %1524 = vmatpush1.msk.msra.mxu0 %vm688_vm0, %v644_v2  ;;  %s1542_s15 = sshll.u32 %s2449_s24, 6  ;;  %v798_v48 = vld [vmem:[#allocation6] sm:$0xff]  ;;  %v880_v51 = vsub.s32 0, %v879_v50  ;;  %v884_v52 = vsub.s32 1, %v879_v50  ;;  %v876_v53 = vld [vmem:[%s2240_s0] sm:$0x3] }
  0xa7   : > { %1525 = vmatmul.mubr.msk.f32.vlgmr.msra.gmra.mxu0 %vm675_vm1, %v645_v5  ;;  %s635_s14 = scalar_lea.vmem %s2394_s1, %s1542_s15  ;;  %s1521_s0 = sshll.u32 %s2449_s24, 3 }
  0xa8   : > { %763 = vmatprep.mubr.f32.mxu0 %v1967_v0  ;;  %v789_v24 = vld [vmem:[%s635_s14 + $0x38] sm:$0xff]  ;;  %v788_v27 = vld [vmem:[%s635_s14 + $0x30] sm:$0xff]  ;;  %v787_v29 = vld [vmem:[%s635_s14 + $0x28] sm:$0xff]  ;;  %v881_v56 = vrot.slane %v876_v53, %v880_v51  ;;  %v885_v57 = vrot.slane %v876_v53, %v884_v52  ;;  %s2443_s28 = sld [smem:[#allocation25_spill]] }
  0xa9   : > { %655 = vperm.xlu1 %1708, %v649_v7   ;;  %v786_v32 = vld [vmem:[%s635_s14 + $0x20] sm:$0xff]  ;;  %v785_v35 = vld [vmem:[%s635_s14 + $0x18] sm:$0xff]  ;;  %v784_v38 = vld [vmem:[%s635_s14 + $0x10] sm:$0xff] }
  0xaa   : > { %665 = vperm.xlu0 %1707, %v651_v8   ;;  %v783_v41 = vld [vmem:[%s635_s14 + $0x8] sm:$0xff]  ;;  %v782_v43 = vld [vmem:[%s635_s14] sm:$0xff]  ;;  %v978_v8 = vld [vmem:[%s2399_s6 + $0x18] sm:$0xff]  ;;  %s639_s21 = scalar_lea.vmem %s2441_s16, %s1521_s0 }
  0xab   : > { %1526 = vmatmul.mubr.msk.f32.gmra.mxu0 %vm675_vm1, %v646_v9  ;;  %v977_v9 = vld [vmem:[%s2399_s6 + $0x10] sm:$0xff] }
  0xac   : > { %769 = vmatprep.mubr.f32.mxu0 %v1967_v0 }
  0xae   : > { %s643_s14 = scalar_lea.vmem %s2443_s28, %s1521_s0 }
  0xaf   : > { %1527 = vmatmul.mubr.msk.f32.gmra.mxu0 %vm675_vm1, %v647_v10  ;;  %v976_v10 = vld [vmem:[%s2399_s6 + $0x8] sm:$0xff] }
  0xb0   : > { %775 = vmatprep.mubr.f32.mxu0 %v1967_v0 }
  0xb3   : > { %1528 = vmatmul.mubr.msk.f32.gmra.mxu0 %vm675_vm1, %v648_v11  ;;  %v975_v11 = vld [vmem:[%s2399_s6] sm:$0xff] }
 0x120   : > { %v661_v19 = vpop.permute.xlu1 %660 }
 0x121   : > { %v671_v16 = vpop.permute.xlu0 %670 }
 0x124   : > { %v656_v30 = vpop.permute.xlu1 %655 }
 0x125   : > { %v666_v21 = vpop.permute.xlu0 %665 }
 0x167   : > { %v759_v12 = vpop.f32.mrf.mxu0 }
 0x168   : > { %v760_v40 = vadd.f32 %v759_v12, %v656_v30 }
 0x169   : > { %v761_v13 = vpop.f32.mrf.mxu0 }
 0x16a   : > { %v762_v37 = vadd.f32 %v761_v13, %v656_v30  ;;  %v790_v47 = vadd.f32 %v782_v43, %v760_v40 }
 0x16b   : > { %v765_v14 = vpop.f32.mrf.mxu0 }
 0x16c   : > { %v766_v34 = vadd.f32 %v765_v14, %v661_v19  ;;  %v791_v46 = vadd.f32 %v783_v41, %v762_v37 }
 0x16d   : > { %v767_v15 = vpop.f32.mrf.mxu0 }
 0x16e   : > { %v768_v31 = vadd.f32 %v767_v15, %v661_v19  ;;  %v792_v45 = vadd.f32 %v784_v38, %v766_v34  ;;  %v1228_v38 = vld [vmem:[%s2405_s12] sm:$0xff] }
 0x16f   : > { %v771_v17 = vpop.f32.mrf.mxu0 }
 0x170   : > { %v772_v28 = vadd.f32 %v771_v17, %v666_v21  ;;  %v793_v44 = vadd.f32 %v785_v35, %v768_v31 }
 0x171   : > { %v773_v18 = vpop.f32.mrf.mxu0 }
 0x172   : > { %v774_v25 = vadd.f32 %v773_v18, %v666_v21  ;;  %v794_v42 = vadd.f32 %v786_v32, %v772_v28  ;;  %v1063_v18 = vld [vmem:[#allocation9 + $0x10] sm:$0xff]  ;;  %v1061_v21 = vld [vmem:[#allocation9] sm:$0xff] }
 0x173   : > { %v777_v20 = vpop.f32.mrf.mxu0 }
 0x174   : > { %v778_v22 = vadd.f32 %v777_v20, %v671_v16  ;;  %v795_v39 = vadd.f32 %v787_v29, %v774_v25  ;;  %v1062_v20 = vld [vmem:[#allocation9 + $0x8] sm:$0xff] }
 0x175   : > { %v779_v23 = vpop.f32.mrf.mxu0 }
 0x176   : > { %v780_v26 = vadd.f32 %v779_v23, %v671_v16  ;;  %v796_v36 = vadd.f32 %v788_v27, %v778_v22  ;;  %v1064_v16 = vld [vmem:[#allocation9 + $0x18] sm:$0xff] }
 0x177   : > { %v1145_v23 = vld [vmem:[%s2403_s10 + $0x10] sm:$0xff]  ;;  %v1530_v27 = vld [vmem:[#allocation7] ss:$0 sm:$0xff] }
 0x178   : > { %929 = vmatprep.subr.mxu0 %v780_v26  ;;  %v797_v33 = vadd.f32 %v789_v24, %v780_v26  ;;  %v1144_v24 = vld [vmem:[%s2403_s10 + $0x8] sm:$0xff]  ;;  %v1231_v26 = vld [vmem:[%s2405_s12 + $0x18] sm:$0xff] }
 0x179   : > { %930 = vmatpush1.xpose.msra.mxu0 %v778_v22  ;;  %v1146_v22 = vld [vmem:[%s2403_s10 + $0x18] sm:$0xff] }
 0x17a   : > { %827 = vmatprep.subr.mxu1 %v797_v33  ;;  %931 = vmatprep.subr.mxu0 %v774_v25  ;;  %v1143_v25 = vld [vmem:[%s2403_s10] sm:$0xff] }
 0x17b   : > { %828 = vmatpush1.msra.mxu1 %v796_v36  ;;  %v1230_v36 = vld [vmem:[%s2405_s12 + $0x10] sm:$0xff] }
 0x17c   : > { %829 = vmatprep.subr.mxu1 %v795_v39  ;;  %v1534_v39 = vld [vmem:[#allocation12] ss:$0 sm:$0xff] }
 0x17d   : > { %830 = vmatpush1.msra.mxu1 %v794_v42  ;;  %932 = vmatpush1.xpose.msra.mxu0 %v772_v28 }
 0x17e   : > { %831 = vmatprep.subr.mxu1 %v793_v44  ;;  %933 = vmatprep.subr.mxu0 %v768_v31  ;;  %v1532_v31 = vld [vmem:[#allocation10] ss:$0 sm:$0xff]  ;;  %v1536_v44 = vld [vmem:[%s2442_s27] ss:$0 sm:$0xff] }
 0x17f   : > { %832 = vmatpush1.msra.mxu1 %v792_v45 }
 0x180   : > { %833 = vmatprep.subr.mxu1 %v791_v46 }
 0x181   : > { %834 = vmatpush1.msra.mxu1 %v790_v47  ;;  %934 = vmatpush1.xpose.msra.mxu0 %v766_v34 }
 0x182   : > { %1529 = vmatmul.mubr.msk.f32.vlgmr.msra.gmra.mxu1 %vm799_vm2, %v798_v48  ;;  %935 = vmatprep.subr.mxu0 %v762_v37  ;;  %v1229_v37 = vld [vmem:[%s2405_s12 + $0x8] sm:$0xff] }
 0x183   : > { %1563 = vmatprep.subr.mxu1 %v1967_v0  ;;  %1571 = vmatprep.mubr.msk.f32.mxu1 %vm1969_vm3, %v1967_v0 }
 0x184   : > { %1564 = vmatpush3.msra.mxu1 %v978_v8 }
 0x185   : > { %936 = vmatpush1.xpose.msra.mxu0 %v760_v40  ;;  %1565 = vmatprep.subr.mxu1 %v1967_v0 }
 0x186   : > { %1585 = vmatprep.subr.mxu0 %v1967_v0  ;;  %1566 = vmatpush3.msra.mxu1 %v977_v9 }
 0x187   : > { %1567 = vmatprep.subr.mxu1 %v1967_v0 }
 0x188   : > { %1568 = vmatpush3.msra.mxu1 %v976_v10 }
 0x189   : > { %1569 = vmatprep.subr.mxu1 %v1967_v0 }
 0x18a   : > { %1570 = vmatpush3.msra.mxu1 %v975_v11 }
 0x18b   : > { %1574 = vmatprep.subr.mxu1 %v1967_v0 }
 0x242   : > { %v869_v54 = vpop.f32.mrf.mxu1 }
 0x243   : > { %v874_v55 = vmul.f32 0.17677669, %v869_v54 }
 0x244   : > { %v871_v58 = vpop.f32.mrf.mxu1 }
 0x245   : > { %v875_v59 = vmul.f32 0.17677669, %v871_v58  ;;  %v888_v60 = vadd.f32 %v881_v56, %v874_v55 }
 0x247   : > { %v889_v61 = vadd.f32 %v885_v57, %v875_v59 }
 0x249   : > { %v890_v62 = vmax.f32 %v888_v60, %v889_v61 }
 0x24b   : > { %891 = vmax.xlane.f32.xlu0 %v890_v62 }
 0x2d4   : > { %v892_v63 = vpop.xlane.xlu0 %891 }
 0x2d5   : > { %v893_v1 = vsub.f32 %v888_v60, %v892_v63  ;;  %v894_v2 = vsub.f32 %v889_v61, %v892_v63 }
 0x2d7   : > { %v895_v3 = vmul.f32 1.442695, %v893_v1  ;;  %v897_v4 = vmul.f32 1.442695, %v894_v2 }
 0x2d9   : > { %1710 = vpow2.f32 %v895_v3 }
 0x2da   : > { %1712 = vpow2.f32 %v897_v4 }
 0x2e6   : > { %v1711_v5 = vpop.eup %1710 }
 0x2e7   : > { %v1713_v6 = vpop.eup %1712 }
 0x2e8   : > { %v899_v7 = vadd.f32 %v1713_v6, %v1711_v5 }
 0x2ea   : > { %900 = vadd.xlane.f32.xlu1 %v899_v7 }
 0x373   : > { %v901_v12 = vpop.xlane.xlu1 %900 }
 0x374   : > { %1714 = vrcp.f32 %v901_v12 }
 0x381   : > { %v1715_v13 = vpop.eup %1714 }
 0x382   : > { %v904_v14 = vmul.f32 %v1715_v13, %v1713_v6  ;;  %v903_v15 = vmul.f32 %v1715_v13, %v1711_v5 }
 0x384   : > { %969 = vmatprep.mubr.f32.mxu0 %v904_v14 }
 0x385   : > { %970 = vmatmul.mubr.f32.vlgmr.msra.gmra.mxu0 %v903_v15 }
 0x386   : > { %1593 = vmatprep.mubr.msk.f32.mxu0 %vm1969_vm3, %v1967_v0  ;;  %1586 = vmatpush3.msra.mxu0 %v1146_v22 }
 0x387   : > { %1587 = vmatprep.subr.mxu0 %v1967_v0 }
 0x388   : > { %1588 = vmatpush3.msra.mxu0 %v1145_v23 }
 0x389   : > { %1589 = vmatprep.subr.mxu0 %v1967_v0 }
 0x38a   : > { %1590 = vmatpush3.msra.mxu0 %v1144_v24 }
 0x38b   : > { %1591 = vmatprep.subr.mxu0 %v1967_v0 }
 0x38c   : > { %1592 = vmatpush3.msra.mxu0 %v1143_v25 }
 0x445   : > { %v971_v17 = vpop.f32.mrf.mxu0 }
 0x446   : > { %1572 = vmatmul.mubr.msk.f32.vlgmr.msra.gmra.mxu1 %vm799_vm2, %v971_v17 }
 0x447   : > { %1575 = vmatpush3.msra.mxu1 %v1064_v16  ;;  %v973_v19 = vpop.f32.mrf.mxu0  ;;  %1582 = vmatprep.mubr.msk.f32.mxu1 %vm1969_vm3, %v1967_v0 }
 0x448   : > { %1576 = vmatprep.subr.mxu1 %v1967_v0 }
 0x449   : > { %1577 = vmatpush3.msra.mxu1 %v1063_v18 }
 0x44a   : > { %1578 = vmatprep.subr.mxu1 %v1967_v0 }
 0x44b   : > { %1579 = vmatpush3.msra.mxu1 %v1062_v20 }
 0x44c   : > { %1580 = vmatprep.subr.mxu1 %v1967_v0 }
 0x44d   : > { %1581 = vmatpush3.msra.mxu1 %v1061_v21 }
 0x44e   : > { %1583 = vmatmul.mubr.msk.f32.vlgmr.msra.gmra.mxu1 %vm799_vm2, %v971_v17  ;;  %1596 = vmatprep.subr.mxu1 %v1967_v0 }
 0x44f   : > { %1604 = vmatprep.mubr.msk.f32.mxu1 %vm1969_vm3, %v1967_v0  ;;  %1597 = vmatpush3.msra.mxu1 %v1231_v26 }
 0x450   : > { %1598 = vmatprep.subr.mxu1 %v1967_v0 }
 0x451   : > { %1599 = vmatpush3.msra.mxu1 %v1230_v36 }
 0x452   : > { %1600 = vmatprep.subr.mxu1 %v1967_v0 }
 0x453   : > { %1601 = vmatpush3.msra.mxu1 %v1229_v37 }
 0x454   : > { %1602 = vmatprep.subr.mxu1 %v1967_v0 }
 0x455   : > { %1603 = vmatpush3.msra.mxu1 %v1228_v38 }
 0x506   : > { %v1055_v28 = vpop.f32.mrf.mxu1 }
 0x507   : > { %v1056_v29 = vadd.f32 %v1530_v27, %v1055_v28 }
 0x508   : > { %v1573_v30 = vpop.f32.mrf.mxu1 }
 0x509   : > { %1060 = vst.msk [vmem:[%s639_s21] sm:$0xff] %vm1059_vm4, %v1056_v29 }
 0x50e   : > { %v1138_v32 = vpop.f32.mrf.mxu1 }
 0x50f   : > { %v1139_v33 = vadd.f32 %v1532_v31, %v1138_v32 }
 0x510   : > { %v1584_v34 = vpop.f32.mrf.mxu1 }
 0x511   : > { %v1142_v35 = vmax.f32 %v1139_v33, 0.0 }
 0x513   : > { %1594 = vmatmul.mubr.msk.f32.vlgmr.msra.gmra.mxu0 %vm799_vm2, %v1142_v35 }
 0x5d3   : > { %v1223_v40 = vpop.f32.mrf.mxu0 }
 0x5d4   : > { %v1224_v41 = vadd.f32 %v1534_v39, %v1223_v40 }
 0x5d5   : > { %v1595_v42 = vpop.f32.mrf.mxu0 }
 0x5d6   : > { %v1227_v43 = vmax.f32 %v1224_v41, 0.0 }
 0x5d8   : > { %1605 = vmatmul.mubr.msk.f32.vlgmr.msra.gmra.mxu1 %vm799_vm2, %v1227_v43 }
 0x698   : > { %v1308_v45 = vpop.f32.mrf.mxu1 }
 0x699   : > { %v1309_v46 = vadd.f32 %v1536_v44, %v1308_v45 }
 0x69a   : > { %v1606_v0 = vpop.f32.mrf.mxu1 }
 0x69b   : > { %v1312_v47 = vsub.f32 0.0, %v1309_v46 }
 0x69d   : > { %v1313_v48 = vmul.f32 1.442695, %v1312_v47 }
 0x69f   : > { %1716 = vpow2.f32 %v1313_v48 }
 0x6ac   : > { %v1717_v49 = vpop.eup %1716 }
 0x6ad   : > { %v1315_v50 = vadd.f32 1.0, %v1717_v49 }
 0x6af   : > { %1718 = vrcp.f32 %v1315_v50 }
 0x6bc   : > { %v1719_v51 = vpop.eup %1718 }
 0x6bd   : > { %1318 = vst.msk [vmem:[%s643_s14] sm:$0xff] %vm675_vm1, %v1719_v51 }
 0x6be PF: > { %p31_p3 = scmp.ge.s32.totalorder %s2141_s17, 4   ;;  %s2444_s18 = smov %s1948_s19 }
 0x6bf   : > { %s2445_s19 = smov %s1952_s20  ;;  %s2446_s20 = smov %s2152_s3 }
 0x6c0   : > { %s2447_s21 = smov %s2141_s17  ;;  %33 = sbr.rel (!%p31_p3) target bundleno = 16 (0x10), region = 164 }
 0x6c5   :  { %1352 = vsyncpa [#allocation3], 1 }
 0x6c6   :  { %1354 = vsyncpa [#allocation3 + $0x1], 1 }
 0x6c7   :  { %1355 = vsyncpa [#allocation5], 1 }
 0x6c8   :  { %1357 = vsyncpa [#allocation5 + $0x1], 1 }
 0x6c9   :  { %1358 = vsyncpa [#allocation8], 1 }
 0x6ca   :  { %1359 = vsyncpa [#allocation11], 1 }

</bundles_post_ra>
